<compile_context>
chip_gen: v5e
topology: v5e:2x2
jax: 0.10.0
libtpu: 0.0.40
codegen_flags: <defaults>
</compile_context>

<pallas_src>
import math

import jax
import jax.numpy as jnp
from jax.experimental import pallas as pl
from jax.experimental.pallas import tpu as pltpu


# ----------------------------------------------------------------------------
# Pallas kernel: fused world-MLP layers 2+3, product with pos_out, rank-sum.
# All operands are transposed so the sample/row axis is the 128-lane axis.
# ----------------------------------------------------------------------------
def uvfa_pos_kernel(h1t_ref, post_ref, w2t_ref, b2_ref, w3t_ref, b3_ref,
                    out_ref):
    # h1t_ref : (H, TM)   bf16  ReLU(layer-1) activations, transposed
    # post_ref: (R, TM)   f32   hoisted pos-MLP outputs, transposed
    # w2t_ref : (H, H)    bf16  W2^T      b2_ref: (H, 1) f32
    # w3t_ref : (R, H)    bf16  W3^T      b3_ref: (R, 1) f32
    # out_ref : (1, TM)   f32   lane-dense output row
    h2 = jnp.dot(w2t_ref[...], h1t_ref[...],
                 preferred_element_type=jnp.float32) + b2_ref[...]
    h2 = jnp.maximum(h2, 0.0).astype(jnp.bfloat16)
    wout = jnp.dot(w3t_ref[...], h2,
                   preferred_element_type=jnp.float32) + b3_ref[...]    # (R, TM)
    prod = wout * post_ref[...]                                         # (R, TM) f32
    # Rank reduction over sublanes; every one of the 128 lanes is occupied, so
    # this is a full-width reduce (the lane-sparse XLU concern does not apply
    # in this transposed layout).
    out_ref[...] = jnp.sum(prod, axis=0, keepdims=True)                 # (1, TM)


def uvfa_pos_pallas(h1, pos_out, w2, b2, w3, b3, *, tile_m=128):
    """h1: (N, H) f32 post-ReLU layer-1 acts; pos_out: (N, R) f32 -> (N,) f32."""
    N, H = h1.shape
    rank = w3.shape[1]

    n_tiles = pl.cdiv(N, tile_m)
    n_pad = n_tiles * tile_m - N
    N_pad = N + n_pad

    # Pad rows (padded columns produce zeros after the product, sliced off below)
    # and transpose so the row axis is lane-major / lane-dense.
    h1t = jnp.pad(h1, ((0, n_pad), (0, 0))).T.astype(jnp.bfloat16)       # (H, N_pad)
    post = jnp.pad(pos_out, ((0, n_pad), (0, 0))).T.astype(jnp.float32)  # (R, N_pad)
    w2t = w2.T.astype(jnp.bfloat16)                                       # (H, H)
    w3t = w3.T.astype(jnp.bfloat16)                                       # (R, H)
    b2c = b2.reshape(-1, 1).astype(jnp.float32)                           # (H, 1)
    b3c = b3.reshape(-1, 1).astype(jnp.float32)                           # (R, 1)

    out = pl.pallas_call(
        uvfa_pos_kernel,
        out_shape=jax.ShapeDtypeStruct((1, N_pad), jnp.float32),
        grid=(n_tiles,),
        in_specs=[
            pl.BlockSpec((H, tile_m), lambda i: (0, i)),      # h1^T tile
            pl.BlockSpec((rank, tile_m), lambda i: (0, i)),   # pos_out^T tile
            pl.BlockSpec((H, H), lambda i: (0, 0)),           # W2^T (resident)
            pl.BlockSpec((H, 1), lambda i: (0, 0)),           # b2
            pl.BlockSpec((rank, H), lambda i: (0, 0)),        # W3^T
            pl.BlockSpec((rank, 1), lambda i: (0, 0)),        # b3
        ],
        out_specs=pl.BlockSpec((1, tile_m), lambda i: (0, i)),
        compiler_params=pltpu.CompilerParams(
            dimension_semantics=("parallel",)),
    )(h1t, post, w2t, b2c, w3t, b3c)

    return out[0, :N]                                                    # (N,)


# ----------------------------------------------------------------------------
# Plain-JAX glue: one-hot encode, layer-1 decomposition, hoisted pos MLP.
# ----------------------------------------------------------------------------
def mlp_ref(x, params):
    n_layers = len(params) // 2
    for i in range(n_layers):
        w, b = params[2 * i], params[2 * i + 1]
        x = jnp.dot(x, w, preferred_element_type=jnp.float32) + b
        if i < n_layers - 1:
            x = jnp.maximum(x, 0.0)
    return x


def uvfa_pos_precompute(state, obj, pos, world_params, pos_params,
                        *, state_vocab, object_vocab, map_dim):
    """Returns (h1, pos_out): ReLU'd layer-1 world activations (N, H) and the
    hoisted pos-MLP outputs expanded per row (N, R)."""
    B = state.shape[0]
    size = map_dim ** 2
    V = state_vocab + object_vocab

    state = state.reshape(B, size)
    obj = obj.reshape(B, size)
    state_binary = jax.nn.one_hot(state, V, dtype=jnp.float32)            # (B, size, V)
    object_binary = jax.nn.one_hot(obj + state_vocab, V, dtype=jnp.float32)
    input_binary = state_binary + object_binary                            # (B, size, V)

    w1, b1 = world_params[0], world_params[1]          # (size*(V+1), H), (1, H)
    H = w1.shape[1]
    w1_r = w1.reshape(size, V + 1, H)
    w1_vocab = w1_r[:, :V, :].reshape(size * V, H)     # vocab rows of W1
    w1_agent = w1_r[:, V, :]                           # agent-channel rows (size, H)

    # Layer-1 decomposition: once per batch instead of once per (batch, agent).
    base = jnp.dot(input_binary.reshape(B, size * V), w1_vocab,
                   preferred_element_type=jnp.float32)                    # (B, H)
    h1 = jnp.maximum(base[:, None, :] + w1_agent[None, :, :] + b1, 0.0)   # (B, size, H)
    h1 = h1.reshape(B * size, H)                                          # (N, H) row j -> (j//size, j%size)

    # Hoisted pos MLP on the B distinct positions, expanded with the original
    # torch repeat semantics: row j -> pos[j % B].
    pos_out_b = mlp_ref(pos, pos_params)                                  # (B, R)
    pos_out = jnp.tile(pos_out_b, (size, 1))                              # (N, R)
    return h1, pos_out


def uvfa_pos_forward(state, obj, pos, world_params, pos_params,
                     *, state_vocab, object_vocab, map_dim):
    B = state.shape[0]
    h1, pos_out = uvfa_pos_precompute(
        state, obj, pos, world_params, pos_params,
        state_vocab=state_vocab, object_vocab=object_vocab, map_dim=map_dim)
    w2, b2, w3, b3 = world_params[2], world_params[3], world_params[4], world_params[5]
    values = uvfa_pos_pallas(h1, pos_out, w2, b2, w3, b3)
    return values.reshape(B, map_dim, map_dim)


# ----------------------------------------------------------------------------
# Pure-JAX dense reference (materializes the full (N, D_in) world matrix).
# Independently validates the layer-1 decomposition and the pos-MLP hoist.
# ----------------------------------------------------------------------------
def build_inputs_dense(state, obj, pos, *, state_vocab, object_vocab, map_dim):
    B = state.shape[0]
    size = map_dim ** 2
    V = state_vocab + object_vocab

    state = state.reshape(B, size)
    obj = obj.reshape(B, size)
    state_binary = jax.nn.one_hot(state, V, dtype=jnp.float32)
    object_binary = jax.nn.one_hot(obj + state_vocab, V, dtype=jnp.float32)
    input_binary = state_binary + object_binary

    world = jnp.broadcast_to(input_binary[:, None, :, :], (B, size, size, V))
    agent_ch = jnp.broadcast_to(jnp.eye(size, dtype=jnp.float32)[None, :, :, None],
                                (B, size, size, 1))
    world = jnp.concatenate([world, agent_ch], axis=-1)
    world = world.reshape(B * size, size * (V + 1))
    pos_rep = jnp.tile(pos, (size, 1))
    return world, pos_rep


def uvfa_pos_reference(state, obj, pos, world_params, pos_params,
                       *, state_vocab, object_vocab, map_dim):
    B = state.shape[0]
    world_inp, pos_rep = build_inputs_dense(
        state, obj, pos, state_vocab=state_vocab,
        object_vocab=object_vocab, map_dim=map_dim)
    values = mlp_ref(world_inp, world_params) * mlp_ref(pos_rep, pos_params)
    return jnp.sum(values, axis=1, keepdims=True).reshape(B, map_dim, map_dim)


def init_mlp_params(key, layer_sizes):
    params = []
    keys = jax.random.split(key, len(layer_sizes) - 1)
    for k, din, dout in zip(keys, layer_sizes[:-1], layer_sizes[1:]):
        bound = 1.0 / math.sqrt(din)
        w = jax.random.uniform(k, (din, dout), jnp.float32, -bound, bound)
        b = jnp.zeros((1, dout), jnp.float32)
        params += [w, b]
    return params


# ----------------------------------------------------------------------------
if __name__ == "__main__":
    # map_dim must be 10: the PyTorch __agent_pos hardcodes 100 = map_dim**2.
    B = 2
    map_dim = 10
    state_vocab = 3
    object_vocab = 3
    total_vocab = state_vocab + object_vocab
    rank = 32
    input_dim = (total_vocab + 1) * map_dim ** 2   # 700

    key = jax.random.PRNGKey(0)
    k_state, k_obj, k_pos, k_wmlp, k_pmlp = jax.random.split(key, 5)

    state = jax.random.randint(k_state, (B, map_dim, map_dim), 0, state_vocab,
                               dtype=jnp.int32)
    obj = jax.random.randint(k_obj, (B, map_dim, map_dim), 0, object_vocab,
                             dtype=jnp.int32)
    pos = jax.random.uniform(k_pos, (B, 2), jnp.float32, 0.0, float(map_dim))

    world_params = init_mlp_params(k_wmlp, [input_dim, 128, 128, rank])
    pos_params = init_mlp_params(k_pmlp, [2, 128, 128, rank])

    map_pred = uvfa_pos_forward(state, obj, pos, world_params, pos_params,
                                state_vocab=state_vocab,
                                object_vocab=object_vocab,
                                map_dim=map_dim)
    map_pred = jax.block_until_ready(map_pred)
    assert map_pred.shape == (B, map_dim, map_dim)
    assert bool(jnp.all(jnp.isfinite(map_pred)))

    ref = uvfa_pos_reference(state, obj, pos, world_params, pos_params,
                             state_vocab=state_vocab,
                             object_vocab=object_vocab,
                             map_dim=map_dim)
    assert bool(jnp.allclose(map_pred, ref, rtol=1e-2, atol=1e-2)), \
        "kernel/reference mismatch"

    print("KERNEL_OK")
</pallas_src>

<mosaic_0001>
module attributes {stable_mosaic.version = 11 : i64} {
  func.func @uvfa_pos_kernel(%arg0: i32, %arg1: memref<128x128xbf16, #tpu.memory_space<vmem>>, %arg2: memref<32x128xf32, #tpu.memory_space<vmem>>, %arg3: memref<128x128xbf16, #tpu.memory_space<vmem>>, %arg4: memref<128x1xf32, #tpu.memory_space<vmem>>, %arg5: memref<32x128xbf16, #tpu.memory_space<vmem>>, %arg6: memref<32x1xf32, #tpu.memory_space<vmem>>, %arg7: memref<1x128xf32, #tpu.memory_space<vmem>>) attributes {dimension_semantics = [#tpu.dimension_semantics<parallel>], iteration_bounds = array<i64: 2>, scalar_prefetch = 0 : i64, scratch_operands = 0 : i64, tpu.core_type = #tpu.core_type<tc>, window_params = [{transform_indices = @transform_0, window_bounds = array<i64: 128, 128>}, {transform_indices = @transform_1, window_bounds = array<i64: 32, 128>}, {pipeline_mode = #tpu.pipeline_mode<synchronous>, transform_indices = @transform_2, window_bounds = array<i64: 128, 128>}, {pipeline_mode = #tpu.pipeline_mode<synchronous>, transform_indices = @transform_3, window_bounds = array<i64: 128, 1>}, {pipeline_mode = #tpu.pipeline_mode<synchronous>, transform_indices = @transform_4, window_bounds = array<i64: 32, 128>}, {pipeline_mode = #tpu.pipeline_mode<synchronous>, transform_indices = @transform_5, window_bounds = array<i64: 32, 1>}, {transform_indices = @transform_6, window_bounds = array<i64: 1, 128>}]} {
    %c0 = arith.constant 0 : index
    %c0_0 = arith.constant 0 : index
    %0 = vector.load %arg3[%c0, %c0_0] : memref<128x128xbf16, #tpu.memory_space<vmem>>, vector<128x128xbf16>
    %c0_1 = arith.constant 0 : index
    %c0_2 = arith.constant 0 : index
    %1 = vector.load %arg1[%c0_1, %c0_2] : memref<128x128xbf16, #tpu.memory_space<vmem>>, vector<128x128xbf16>
    %cst = arith.constant dense<0.000000e+00> : vector<128x128xf32>
    %2 = tpu.matmul %0, %1, %cst {dimension_numbers = #tpu.dot_dimension_numbers<[1], [0], [0], [1], [0, 0, 1, 1], [], []>} : vector<128x128xbf16>, vector<128x128xbf16>, vector<128x128xf32> -> vector<128x128xf32>
    %c0_3 = arith.constant 0 : index
    %c0_4 = arith.constant 0 : index
    %3 = vector.load %arg4[%c0_3, %c0_4] : memref<128x1xf32, #tpu.memory_space<vmem>>, vector<128x1xf32>
    %4 = vector.broadcast %3 : vector<128x1xf32> to vector<128x128xf32>
    %5 = arith.addf %2, %4 : vector<128x128xf32>
    %cst_5 = arith.constant 0.000000e+00 : f32
    %6 = vector.broadcast %cst_5 : f32 to vector<128x128xf32>
    %7 = arith.maximumf %5, %6 : vector<128x128xf32>
    %8 = arith.truncf %7 : vector<128x128xf32> to vector<128x128xbf16>
    %c0_6 = arith.constant 0 : index
    %c0_7 = arith.constant 0 : index
    %9 = vector.load %arg5[%c0_6, %c0_7] : memref<32x128xbf16, #tpu.memory_space<vmem>>, vector<32x128xbf16>
    %cst_8 = arith.constant dense<0.000000e+00> : vector<32x128xf32>
    %10 = tpu.matmul %9, %8, %cst_8 {dimension_numbers = #tpu.dot_dimension_numbers<[1], [0], [0], [1], [0, 0, 1, 1], [], []>} : vector<32x128xbf16>, vector<128x128xbf16>, vector<32x128xf32> -> vector<32x128xf32>
    %c0_9 = arith.constant 0 : index
    %c0_10 = arith.constant 0 : index
    %11 = vector.load %arg6[%c0_9, %c0_10] : memref<32x1xf32, #tpu.memory_space<vmem>>, vector<32x1xf32>
    %12 = vector.broadcast %11 : vector<32x1xf32> to vector<32x128xf32>
    %13 = arith.addf %10, %12 : vector<32x128xf32>
    %c0_11 = arith.constant 0 : index
    %c0_12 = arith.constant 0 : index
    %14 = vector.load %arg2[%c0_11, %c0_12] : memref<32x128xf32, #tpu.memory_space<vmem>>, vector<32x128xf32>
    %15 = arith.mulf %13, %14 : vector<32x128xf32>
    %cst_13 = arith.constant dense<0.000000e+00> : vector<128xf32>
    %16 = vector.multi_reduction <add>, %15, %cst_13 [0] : vector<32x128xf32> to vector<128xf32>
    %17 = vector.shape_cast %16 : vector<128xf32> to vector<1x128xf32>
    %c0_14 = arith.constant 0 : index
    %c0_15 = arith.constant 0 : index
    %18 = vector.load %arg7[%c0_14, %c0_15] : memref<1x128xf32, #tpu.memory_space<vmem>>, vector<1x128xf32>
    tpu.vector_store %arg7[%c0_14, %c0_15], %17 {strides = array<i32>} : memref<1x128xf32, #tpu.memory_space<vmem>>, vector<1x128xf32>,
    return
  }
  func.func @transform_0(%arg0: i32) -> (i32, i32) {
    %c0_i32 = arith.constant 0 : i32
    %c0_i32_0 = arith.constant 0 : i32
    return %c0_i32, %arg0 : i32, i32
  }
  func.func @transform_1(%arg0: i32) -> (i32, i32) {
    %c0_i32 = arith.constant 0 : i32
    %c0_i32_0 = arith.constant 0 : i32
    return %c0_i32, %arg0 : i32, i32
  }
  func.func @transform_2(%arg0: i32) -> (i32, i32) {
    %c0_i32 = arith.constant 0 : i32
    %c0_i32_0 = arith.constant 0 : i32
    %c0_i32_1 = arith.constant 0 : i32
    return %c0_i32, %c0_i32_0 : i32, i32
  }
  func.func @transform_3(%arg0: i32) -> (i32, i32) {
    %c0_i32 = arith.constant 0 : i32
    %c0_i32_0 = arith.constant 0 : i32
    %c0_i32_1 = arith.constant 0 : i32
    return %c0_i32, %c0_i32_0 : i32, i32
  }
  func.func @transform_4(%arg0: i32) -> (i32, i32) {
    %c0_i32 = arith.constant 0 : i32
    %c0_i32_0 = arith.constant 0 : i32
    %c0_i32_1 = arith.constant 0 : i32
    return %c0_i32, %c0_i32_0 : i32, i32
  }
  func.func @transform_5(%arg0: i32) -> (i32, i32) {
    %c0_i32 = arith.constant 0 : i32
    %c0_i32_0 = arith.constant 0 : i32
    %c0_i32_1 = arith.constant 0 : i32
    return %c0_i32, %c0_i32_0 : i32, i32
  }
  func.func @transform_6(%arg0: i32) -> (i32, i32) {
    %c0_i32 = arith.constant 0 : i32
    %c0_i32_0 = arith.constant 0 : i32
    return %c0_i32, %arg0 : i32, i32
  }
}

</mosaic_0001>

<bundles_post_ra>
// kernel: tpu_custom_call.1
= control target key start
LH: loop header
LB: loop body
LE: loop exit
PB: predicated region body
PF: predicated region fallthrough
CT: control target
= control target key end

     0   :  { %s1490_s0 = inlined_call_operand.vmem [shape: bf16[128,256], index: 0, kind: input, shape index: {}]   ;;  %s1491_s1 = inlined_call_operand.hbm [shape: f32[32,256], index: 1, kind: input, shape index: {}]   ;;  %s1492_s2 = inlined_call_operand.hbm [shape: bf16[128,128], index: 2, kind: input, shape index: {}]   ;;  %s1493_s3 = inlined_call_operand.vmem [shape: f32[128,1], index: 3, kind: input, shape index: {}]   ;;  %s1494_s4 = inlined_call_operand.vmem [shape: bf16[32,128], index: 4, kind: input, shape index: {}]   ;;  %s1495_s5 = inlined_call_operand.vmem [shape: f32[32,1], index: 5, kind: input, shape index: {}]   ;;  %s1496_s6 = inlined_call_operand.hbm [shape: f32[1,256], index: 6, kind: output, shape index: {}]  }
   0x1   :  { %1498 = sst [smem:[#allocation14_spill]] %s1490_s0 }
   0x2   :  { %1499 = sst [smem:[#allocation15_spill]] %s1492_s2 }
   0x3   :  { %11 = vsyncpa [#allocation4], 0 }
   0x4   :  { %13 = vsyncpa [#allocation4 + $0x1], 0 }
   0x5   :  { %14 = vsyncpa [#allocation7], 0 }
   0x6   :  { %15 = vsyncpa [#allocation5], 0 }
   0x7   :  { %17 = vsyncpa [#allocation5 + $0x1], 0  ;;  %s1244_s21 = smov 0   ;;  %s1246_s22 = smov 0  }
   0x8   :  { %s1248_s23 = smov 0   ;;  %s1250_s24 = smov 0  }
   0x9 LB: > { %1500 = sst [smem:[#allocation12_spill]] %s1196_s23  ;;  %s1265_s25 = sadd.s32 4294967295, %s1200_s24   ;;  %s1200_s24 = sphi %s1250_s24, %s1513_s24   ;;  %s1196_s23 = sphi %s1248_s23, %s1510_s23   ;;  %s1192_s22 = sphi %s1246_s22, %s1512_s22   ;;  %s1188_s21 = sphi %s1244_s21, %s1511_s21  }
   0xa   : > { %s891_s26 = sadd.s32 4294967294, %s1200_s24   ;;  %s1269_s27 = sadd.s32 1, %s1200_s24  }
   0xb   : > { %s30_s28 = sadd.s32 1, %s1196_s23  ;;  %s27_s29 = ssub.s32 %s1200_s24, %s1269_s27 }
   0xc   : > { %p37_p0 = scmp.ne.s32.totalorder %s1196_s23, %s1192_s22  ;;  %p28_p1 = scmp.eq.s32.totalorder %s27_s29, 0 }
   0xd   : > { %p38_p2 = scmp.eq.s32.totalorder %s1200_s24, 0  ;;  %p69_p3 = scmp.ne.s32.totalorder %s1192_s22, %s1188_s21 }
   0xe   : > { %p70_p4 = scmp.eq.s32.totalorder %s1265_s25, 0  ;;  %p177_p7 = scmp.eq.s32.totalorder %s1265_s25, 1 }
   0xf   : > { %s1281_s30 = scalar_select %p28_p1, %s1196_s23, %s30_s28  }
  0x10   : > { %p1283_p5 = por %p38_p2, %p37_p0  ;;  %p1289_p6 = por %p70_p4, %p69_p3 }
  0x11   : > { %1501 = sst [smem:[#allocation13_spill]] %s1281_s30  ;;  %p183_p8 = scmp.eq.s32.totalorder %s891_s26, 1 }
  0x12   : > { %p892_p9 = scmp.ge.s32.totalorder %s1200_s24, 1  ;;  %p190_p10 = scmp.lt.s32.totalorder %s1200_s24, 3 }
  0x13   : > { %p1296_p11 = por %p177_p7, %p37_p0  ;;  %p1300_p12 = por %p183_p8, %p69_p3 }
  0x14   : > { %p1304_p13 = pnand %p892_p9, %p190_p10  ;;  %s1507_s2 = sld [smem:[#allocation15_spill]] }
  0x15   : > { %s1202_s15 = smov [#allocation6]   ;;  %s1203_s17 = smov 64  }
  0x16   : > { %p1019_p1 = pneg %p1304_p13  ;;  %s203_s16 = sshll.u32 %s1202_s15, 4  ;;  %s204_s16 = int_to_ptr.vmem [resolvable:$true] %s203_s16 }
  0x17   : > { %s1204_s18 = smov 4   ;;  %p894_p2 = scmp.ge.s32.totalorder %s1200_s24, 2 }
  0x18   : > { %p1020_p0 = pnand %p1019_p1, %p70_p4 }
  0x19   : > { %222 = sbr.rel (%p894_p2) target bundleno = 74 (0x4a), region = 32 }
  0x1a   : > { %s201_s14 = sshll.u32 %s1507_s2, 4  ;;  %s202_s14 = int_to_ptr.hbm [resolvable:$true] %s201_s14 }
  0x1b   : > { %1022 = dma.hbm_to_vmem [thread:$0]  (!%p1020_p0), %s202_s14, 1024, %s204_s16, [#allocation7], %s1203_s17, %s1203_s17, %s1204_s18  }
  0x1e   : > { %225 = sbr.rel (!%p1283_p5) target bundleno = 56 (0x38), region = 36  ;;  %s227_s19 = sand.u32 (%p1283_p5), 1, %s1196_s23  }
  0x1f   : > { %s896_s20 = sshll.u32 (%p1283_p5), %s1200_s24, 2  ;;  %s895_s26 = sshll.u32 (%p1283_p5), %s227_s19, 6 }
  0x20   : > { %s1508_s0 = sld [smem:[#allocation14_spill]] (%p1283_p5)  ;;  %s229_s13 = scalar_lea.vmem (%p1283_p5), [#allocation2], %s895_s26 }
  0x26   : > { %s1325_s12 = scalar_lea.vmem %s1508_s0, %s896_s20 }
  0x27   : > { %v248_v0 = vld [vmem:[%s1325_s12] sm:$0xf]  ;;  %v250_v1 = vld [vmem:[%s1325_s12 + $0x8] sm:$0xf]  ;;  %v252_v2 = vld [vmem:[%s1325_s12 + $0x10] sm:$0xf] }
  0x28   : > { %249 = vst [vmem:[%s229_s13] sm:$0xf] %v248_v0  ;;  %v254_v3 = vld [vmem:[%s1325_s12 + $0x18] sm:$0xf]  ;;  %v256_v4 = vld [vmem:[%s1325_s12 + $0x20] sm:$0xf] }
  0x29   : > { %251 = vst [vmem:[%s229_s13 + $0x4] sm:$0xf] %v250_v1  ;;  %v258_v5 = vld [vmem:[%s1325_s12 + $0x28] sm:$0xf]  ;;  %v260_v6 = vld [vmem:[%s1325_s12 + $0x30] sm:$0xf] }
  0x2a   : > { %253 = vst [vmem:[%s229_s13 + $0x8] sm:$0xf] %v252_v2  ;;  %v262_v7 = vld [vmem:[%s1325_s12 + $0x38] sm:$0xf]  ;;  %v264_v8 = vld [vmem:[%s1325_s12 + $0x40] sm:$0xf] }
  0x2b   : > { %255 = vst [vmem:[%s229_s13 + $0xc] sm:$0xf] %v254_v3  ;;  %v266_v9 = vld [vmem:[%s1325_s12 + $0x48] sm:$0xf]  ;;  %v268_v10 = vld [vmem:[%s1325_s12 + $0x50] sm:$0xf] }
  0x2c   : > { %257 = vst [vmem:[%s229_s13 + $0x10] sm:$0xf] %v256_v4  ;;  %v270_v11 = vld [vmem:[%s1325_s12 + $0x58] sm:$0xf]  ;;  %v272_v12 = vld [vmem:[%s1325_s12 + $0x60] sm:$0xf] }
  0x2d   : > { %259 = vst [vmem:[%s229_s13 + $0x14] sm:$0xf] %v258_v5  ;;  %v274_v13 = vld [vmem:[%s1325_s12 + $0x68] sm:$0xf]  ;;  %v276_v14 = vld [vmem:[%s1325_s12 + $0x70] sm:$0xf] }
  0x2e   : > { %261 = vst [vmem:[%s229_s13 + $0x18] sm:$0xf] %v260_v6  ;;  %v278_v15 = vld [vmem:[%s1325_s12 + $0x78] sm:$0xf] }
  0x2f   : > { %263 = vst [vmem:[%s229_s13 + $0x1c] sm:$0xf] %v262_v7 }
  0x30   : > { %265 = vst [vmem:[%s229_s13 + $0x20] sm:$0xf] %v264_v8 }
  0x31   : > { %267 = vst [vmem:[%s229_s13 + $0x24] sm:$0xf] %v266_v9 }
  0x32   : > { %269 = vst [vmem:[%s229_s13 + $0x28] sm:$0xf] %v268_v10 }
  0x33   : > { %271 = vst [vmem:[%s229_s13 + $0x2c] sm:$0xf] %v270_v11 }
  0x34   : > { %273 = vst [vmem:[%s229_s13 + $0x30] sm:$0xf] %v272_v12 }
  0x35   : > { %275 = vst [vmem:[%s229_s13 + $0x34] sm:$0xf] %v274_v13 }
  0x36   : > { %277 = vst [vmem:[%s229_s13 + $0x38] sm:$0xf] %v276_v14 }
  0x37   : > { %279 = vst [vmem:[%s229_s13 + $0x3c] sm:$0xf] %v278_v15 }
  0x38 PF: > { %s336_s14 = sand.u32 1, %s1196_s23   ;;  %s898_s15 = sshll.u32 %s1200_s24, 3 }
  0x39   : > { %s897_s16 = sshll.u32 %s336_s14, 5  ;;  %s344_s19 = scalar_lea.hbm %s1491_s1, %s898_s15 }
  0x3a   : > { %s345_s20 = sshll.u32 %s344_s19, 4  ;;  %s340_s26 = scalar_lea.vmem [#allocation3], %s897_s16  ;;  %s346_s20 = int_to_ptr.hbm [resolvable:$true] %s345_s20 }
  0x3b   : > { %s347_s28 = sshll.u32 %s340_s26, 4  ;;  %s337_s29 = scalar_lea.sflag [#allocation4], %s336_s14  ;;  %s348_s28 = int_to_ptr.vmem [resolvable:$true] %s347_s28 }
  0x3c   : > { %s1102_s12 = sshra.s32 %s346_s20, 4  ;;  %s1108_s30 = scalar_lea.hbm %s1491_s1, 64  ;;  %s1103_s12 = int_to_ptr.hbm [resolvable:$true] %s1102_s12 }
  0x3d   : > { %s1104_s13 = scalar_lea.hbm %s1103_s12, 32  ;;  %p1109_p9 = scmp.lt.s32.totalorder %s1103_s12, %s1491_s1 }
  0x3e   : > { %p1105_p3 = scmp.ne.s32.totalorder %s1103_s12, %s1104_s13  ;;  %p1110_p10 = scmp.lt.s32.totalorder %s1108_s30, %s1104_s13 }
  0x40   : > { %p1106_p7 = pnand %p1105_p3, %p1283_p5  ;;  %p1111_p1 = por %p1110_p10, %p1109_p9 }
  0x42   : > { %p1107_p8 = pneg %p1106_p7 }
  0x44   : > { %p1112_p0 = pnand %p1111_p1, %p1107_p8 }
  0x46   : > { %1115 = shalt.err (!%p1112_p0)
}
  0x47   : > { %s1205_s14 = smov 256   ;;  %s1206_s15 = smov 128  }
  0x48   : > { %s1207_s16 = smov 8  }
  0x49   : > { %1013 = dma.hbm_to_vmem [thread:$0]  (%p1283_p5), %s346_s20, 512, %s348_s28, %s337_s29, %s1205_s14, %s1206_s15, %s1207_s16  }
  0x4a PF: > { %359 = sbr.rel (%p1304_p13) target bundleno = 496 (0x1f0), region = 81  ;;  %s1361_s0 = sand.u32 (!%p1304_p13), 1, %s1192_s22  }
  0x4b   : > { %s900_s2 = sshll.u32 (!%p1304_p13), %s1361_s0, 6  ;;  %s901_s23 = sshll.u32 (!%p1304_p13), %s1361_s0, 5 }
  0x4c   : > { %s1365_s30 = scalar_lea.vmem (!%p1304_p13), [#allocation2], %s900_s2  ;;  %s369_s18 = scalar_lea.sflag (!%p1304_p13), [#allocation4], %s1361_s0 }
  0x4d   : > { %s1368_s19 = scalar_lea.vmem (!%p1304_p13), [#allocation3], %s901_s23 }
  0x4f   : > { %1175 = dma.done.wait (%p1289_p6), %s369_s18, 512  }
  0x50   : > { %1177 = vsyncadd (%p1289_p6), %s369_s18, 4294966784 }
  0x51   : > { %1179 = dma.done.wait (%p70_p4), [#allocation7], 1024  }
  0x52   : > { %1181 = vsyncadd (%p70_p4), [#allocation7], 4294966272  ;;  %v1208_v16 = vmov 0   ;;  %v992_v17 = vld [vmem:[%s1365_s30 + $0x38] sm:$0xff]  ;;  %v991_v18 = vld [vmem:[%s1365_s30 + $0x30] sm:$0xff]  ;;  %s793_s16 = scalar_lea.hbm %s1496_s6, %s1265_s25  ;;  %s409_s2 = scalar_lea.vmem [#allocation8], %s1361_s0 }
  0x53   : > { %1069 = vset.pattern.permute.xlu0 %v1208_v16  ;;  %1070 = vset.pattern.permute.xlu1 %v1208_v16  ;;  %v456_v19 = vld [vmem:[%s1493_s3 + $0x70] sm:$0xff]  ;;  %v454_v20 = vld [vmem:[%s1493_s3 + $0x60] sm:$0xff]  ;;  %v990_v21 = vld [vmem:[%s1365_s30 + $0x28] sm:$0xff]  ;;  %s795_s23 = sshll.u32 %s409_s2, 4  ;;  %s797_s18 = sshll.u32 %s793_s16, 4  ;;  %s796_s23 = int_to_ptr.vmem [resolvable:$true] %s795_s23  ;;  %s798_s18 = int_to_ptr.hbm [resolvable:$true] %s797_s18 }
  0x54   : > { %1071 = vset.pattern.permute.xlu2 %v1208_v16  ;;  %995 = vmatpush.bf16.msra.mxu2 %v992_v17  ;;  %v457_v22 = vld [vmem:[%s1493_s3 + $0x78] sm:$0xff]  ;;  %v455_v23 = vld [vmem:[%s1493_s3 + $0x68] sm:$0xff]  ;;  %v989_v24 = vld [vmem:[%s1365_s30 + $0x20] sm:$0xff]  ;;  %s1144_s7 = sshra.s32 %s798_s18, 4  ;;  %s1150_s25 = scalar_lea.hbm %s1496_s6, 2  ;;  %s1145_s7 = int_to_ptr.hbm [resolvable:$true] %s1144_s7 }
  0x55   : > { %996 = vmatpush.bf16.msra.mxu3 %v992_v17  ;;  %634 = vmatpush.bf16.msra.mxu0 %v992_v17  ;;  %v988_v25 = vld [vmem:[%s1365_s30 + $0x18] sm:$0xff]  ;;  %v450_v26 = vld [vmem:[%s1493_s3 + $0x40] sm:$0xff]  ;;  %v451_v27 = vld [vmem:[%s1493_s3 + $0x48] sm:$0xff]  ;;  %s1146_s8 = scalar_lea.hbm %s1145_s7, 1  ;;  %p1151_p13 = scmp.lt.s32.totalorder %s1145_s7, %s1496_s6 }
  0x56   : > { %530 = vperm.xlu0 %1069, %v456_v19   ;;  %520 = vperm.xlu1 %1070, %v454_v20   ;;  %v987_v28 = vld [vmem:[%s1365_s30 + $0x10] sm:$0xff]  ;;  %v986_v30 = vld [vmem:[%s1365_s30 + $0x8] sm:$0xff]  ;;  %v449_v31 = vld [vmem:[%s1493_s3 + $0x38] sm:$0xff]  ;;  %p1147_p4 = scmp.ne.s32.totalorder %s1145_s7, %s1146_s8  ;;  %p1152_p3 = scmp.lt.s32.totalorder %s1150_s25, %s1146_s8 }
  0x57   : > { %v452_v29 = vld [vmem:[%s1493_s3 + $0x50] sm:$0xff]  ;;  %v446_v32 = vld [vmem:[%s1493_s3 + $0x20] sm:$0xff]  ;;  %v982_v35 = vld [vmem:[#allocation6 + $0x28] sm:$0xff] }
  0x58   : > { %997 = vmatpush.bf16.msra.mxu2 %v991_v18  ;;  %510 = vperm.xlu2 %1071, %v452_v29   ;;  %v985_v33 = vld [vmem:[%s1365_s30] sm:$0xff]  ;;  %v979_v34 = vld [vmem:[#allocation6 + $0x10] sm:$0xff]  ;;  %v445_v38 = vld [vmem:[%s1493_s3 + $0x18] sm:$0xff]  ;;  %p1148_p5 = pnand %p1147_p4, %p1296_p11  ;;  %p1153_p7 = por %p1152_p3, %p1151_p13 }
  0x59   : > { %998 = vmatpush.bf16.msra.mxu3 %v991_v18  ;;  %635 = vmatpush.bf16.msra.mxu0 %v991_v18  ;;  %v977_v36 = vld [vmem:[#allocation6] sm:$0xff]  ;;  %v444_v37 = vld [vmem:[%s1493_s3 + $0x10] sm:$0xff]  ;;  %v453_v39 = vld [vmem:[%s1493_s3 + $0x58] sm:$0xff] }
  0x5a   : > { %v448_v40 = vld [vmem:[%s1493_s3 + $0x30] sm:$0xff]  ;;  %v443_v41 = vld [vmem:[%s1493_s3 + $0x8] sm:$0xff]  ;;  %v711_v42 = vld [vmem:[%s1495_s5] sm:$0xff]  ;;  %p1149_p6 = pneg %p1148_p5 }
  0x5b   : > { %v980_v43 = vld [vmem:[#allocation6 + $0x18] sm:$0xff]  ;;  %v983_v44 = vld [vmem:[#allocation6 + $0x30] sm:$0xff]  ;;  %v978_v45 = vld [vmem:[#allocation6 + $0x8] sm:$0xff] }
  0x5c   : > { %999 = vmatpush.bf16.msra.mxu2 %v990_v21  ;;  %v447_v46 = vld [vmem:[%s1493_s3 + $0x28] sm:$0xff]  ;;  %v713_v47 = vld [vmem:[%s1495_s5 + $0x10] sm:$0xff]  ;;  %v714_v48 = vld [vmem:[%s1495_s5 + $0x18] sm:$0xff]  ;;  %p1154_p8 = pnand %p1153_p7, %p1149_p6 }
  0x5d   : > { %1000 = vmatpush.bf16.msra.mxu3 %v990_v21  ;;  %636 = vmatpush.bf16.msra.mxu0 %v990_v21  ;;  %v442_v49 = vld [vmem:[%s1493_s3] sm:$0xff]  ;;  %v984_v51 = vld [vmem:[#allocation6 + $0x38] sm:$0xff]  ;;  %v712_v52 = vld [vmem:[%s1495_s5 + $0x8] sm:$0xff] }
  0x5e   : > { %535 = vperm.xlu0 %1069, %v457_v22   ;;  %525 = vperm.xlu1 %1070, %v455_v23   ;;  %v981_v50 = vld [vmem:[#allocation6 + $0x20] sm:$0xff] }
  0x60   : > { %1001 = vmatpush.bf16.msra.mxu2 %v989_v24  ;;  %515 = vperm.xlu2 %1071, %v453_v39  }
  0x61   : > { %1002 = vmatpush.bf16.msra.mxu3 %v989_v24  ;;  %637 = vmatpush.bf16.msra.mxu0 %v989_v24 }
  0x64   : > { %1003 = vmatpush.bf16.msra.mxu2 %v988_v25 }
  0x65   : > { %1004 = vmatpush.bf16.msra.mxu3 %v988_v25  ;;  %638 = vmatpush.bf16.msra.mxu0 %v988_v25 }
  0x66   : > { %500 = vperm.xlu0 %1069, %v450_v26   ;;  %505 = vperm.xlu1 %1070, %v451_v27  }
  0x68   : > { %1005 = vmatpush.bf16.msra.mxu2 %v987_v28  ;;  %490 = vperm.xlu2 %1071, %v448_v40  }
  0x69   : > { %1006 = vmatpush.bf16.msra.mxu3 %v987_v28  ;;  %639 = vmatpush.bf16.msra.mxu0 %v987_v28 }
  0x6c   : > { %1007 = vmatpush.bf16.msra.mxu2 %v986_v30 }
  0x6d   : > { %1008 = vmatpush.bf16.msra.mxu3 %v986_v30  ;;  %640 = vmatpush.bf16.msra.mxu0 %v986_v30 }
  0x6e   : > { %495 = vperm.xlu0 %1069, %v449_v31   ;;  %480 = vperm.xlu1 %1070, %v446_v32  }
  0x70   : > { %1009 = vmatpush.bf16.msra.mxu2 %v985_v33  ;;  %485 = vperm.xlu2 %1071, %v447_v46  }
  0x71   : > { %1010 = vmatpush.bf16.msra.mxu3 %v985_v33  ;;  %641 = vmatpush.bf16.msra.mxu0 %v985_v33 }
  0x73   : > { %652 = vmatmul.bf16.vlgmr.msra.gmra.mxu2 %v979_v34 }
  0x74   : > { %667 = vmatmul.bf16.vlgmr.msra.gmra.mxu3 %v982_v35  ;;  %642 = vmatmul.bf16.vlgmr.msra.gmra.mxu0 %v977_v36 }
  0x76   : > { %470 = vperm.xlu0 %1069, %v444_v37   ;;  %475 = vperm.xlu1 %1070, %v445_v38  }
  0x78   : > { %460 = vperm.xlu2 %1071, %v442_v49  }
  0x7e   : > { %465 = vperm.xlu0 %1069, %v443_v41   ;;  %717 = vperm.xlu1 %1070, %v711_v42  }
  0x80   : > { %722 = vperm.xlu2 %1071, %v712_v52  }
  0x83   : > { %657 = vmatmul.bf16.gmra.mxu2 %v980_v43 }
  0x84   : > { %672 = vmatmul.bf16.gmra.mxu3 %v983_v44  ;;  %647 = vmatmul.bf16.gmra.mxu0 %v978_v45 }
  0x86   : > { %727 = vperm.xlu0 %1069, %v713_v47   ;;  %732 = vperm.xlu1 %1070, %v714_v48  }
  0x93   : > { %662 = vmatmul.bf16.gmra.mxu2 %v981_v50 }
  0x94   : > { %677 = vmatmul.bf16.gmra.mxu3 %v984_v51 }
  0xb2   : > { %v511_v61 = vpop.permute.xlu2 %510 }
  0xba   : > { %v516_v4 = vpop.permute.xlu2 %515 }
  0xc2   : > { %v491_v13 = vpop.permute.xlu2 %490 }
  0xc8   : > { %v531_v57 = vpop.permute.xlu0 %530  ;;  %v521_v60 = vpop.permute.xlu1 %520 }
  0xca   : > { %v486_v31 = vpop.permute.xlu2 %485 }
  0xd0   : > { %v536_v62 = vpop.permute.xlu0 %535  ;;  %v526_v2 = vpop.permute.xlu1 %525 }
  0xd2   : > { %v461_v48 = vpop.permute.xlu2 %460 }
  0xd8   : > { %v501_v5 = vpop.permute.xlu0 %500  ;;  %v506_v9 = vpop.permute.xlu1 %505 }
  0xe0   : > { %v496_v17 = vpop.permute.xlu0 %495  ;;  %v481_v28 = vpop.permute.xlu1 %480 }
  0xe8   : > { %v471_v36 = vpop.permute.xlu0 %470  ;;  %v476_v45 = vpop.permute.xlu1 %475 }
  0xf0   : > { %v466_v51 = vpop.permute.xlu0 %465 }
  0xf1   : > { %v643_v1 = vpop.f32.mrf.mxu0 }
  0xf2   : > { %v644_v52 = vadd.f32 %v643_v1, %v461_v48  ;;  %v718_v1 = vpop.permute.xlu1 %717 }
  0xf6   : > { %v653_v53 = vpop.f32.mrf.mxu2 }
  0xf7   : > { %v668_v54 = vpop.f32.mrf.mxu3  ;;  %v654_v38 = vadd.f32 %v653_v53, %v481_v28 }
  0xf8   : > { %v669_v22 = vadd.f32 %v668_v54, %v511_v61  ;;  %v993_v61 = vld [vmem:[%s1494_s4] sm:$0xff] }
  0xf9   : > { %v645_v7 = vpop.f32.mrf.mxu0  ;;  %v687_v44 = vmax.f32 %v654_v38, 0.0 }
  0xfa   : > { %v693_v29 = vmax.f32 %v669_v22, 0.0  ;;  %v646_v54 = vadd.f32 %v645_v7, %v466_v51 }
  0xfe   : > { %v655_v55 = vpop.f32.mrf.mxu2 }
  0xff   : > { %v670_v56 = vpop.f32.mrf.mxu3  ;;  %v656_v39 = vadd.f32 %v655_v55, %v486_v31  ;;  %v684_v55 = vmax.f32 %v646_v54, 0.0 }
 0x100   : > { %v671_v18 = vadd.f32 %v670_v56, %v516_v4 }
 0x101   : > { %v648_v24 = vpop.f32.mrf.mxu0  ;;  %v688_v46 = vmax.f32 %v656_v39, 0.0 }
 0x102   : > { %v694_v25 = vmax.f32 %v671_v18, 0.0  ;;  %v649_v47 = vadd.f32 %v648_v24, %v471_v36 }
 0x103   : > { %v701_v53 = vpack.c.bf16 %v688_v46, %v687_v44 }
 0x104   : > { %v704_v35 = vpack.c.bf16 %v694_v25, %v693_v29  ;;  %v685_v56 = vmax.f32 %v649_v47, 0.0 }
 0x106   : > { %v658_v58 = vpop.f32.mrf.mxu2 }
 0x107   : > { %v673_v59 = vpop.f32.mrf.mxu3  ;;  %v659_v32 = vadd.f32 %v658_v58, %v491_v13  ;;  %v683_v58 = vmax.f32 %v644_v52, 0.0 }
 0x108   : > { %v674_v14 = vadd.f32 %v673_v59, %v521_v60 }
 0x109   : > { %v689_v40 = vmax.f32 %v659_v32, 0.0  ;;  %v650_v43 = vpop.f32.mrf.mxu0  ;;  %v699_v60 = vpack.c.bf16 %v684_v55, %v683_v58 }
 0x10a   : > { %v695_v23 = vmax.f32 %v674_v14, 0.0  ;;  %v651_v49 = vadd.f32 %v650_v43, %v476_v45  ;;  %v733_v14 = vpop.permute.xlu1 %732 }
 0x10e   : > { %v660_v0 = vpop.f32.mrf.mxu2 }
 0x10f   : > { %v675_v63 = vpop.f32.mrf.mxu3  ;;  %v661_v33 = vadd.f32 %v660_v0, %v496_v17 }
 0x110   : > { %v676_v11 = vadd.f32 %v675_v63, %v526_v2  ;;  %v723_v2 = vpop.permute.xlu2 %722 }
 0x111   : > { %v690_v41 = vmax.f32 %v661_v33, 0.0 }
 0x112   : > { %v696_v19 = vmax.f32 %v676_v11, 0.0 }
 0x113   : > { %v702_v50 = vpack.c.bf16 %v690_v41, %v689_v40 }
 0x114   : > { %v705_v27 = vpack.c.bf16 %v696_v19, %v695_v23 }
 0x116   : > { %v663_v6 = vpop.f32.mrf.mxu2 }
 0x117   : > { %v678_v3 = vpop.f32.mrf.mxu3  ;;  %v664_v30 = vadd.f32 %v663_v6, %v501_v5  ;;  %v728_v5 = vpop.permute.xlu0 %727  ;;  %v767_v6 = vld [vmem:[%s1368_s19 + $0x8] sm:$0xff] }
 0x118   : > { %v679_v8 = vadd.f32 %v678_v3, %v531_v57  ;;  %v686_v57 = vmax.f32 %v651_v49, 0.0 }
 0x119   : > { %v691_v37 = vmax.f32 %v664_v30, 0.0 }
 0x11a   : > { %v697_v15 = vmax.f32 %v679_v8, 0.0  ;;  %v700_v59 = vpack.c.bf16 %v686_v57, %v685_v56 }
 0x11e   : > { %v665_v21 = vpop.f32.mrf.mxu2 }
 0x11f   : > { %v680_v10 = vpop.f32.mrf.mxu3  ;;  %v666_v26 = vadd.f32 %v665_v21, %v506_v9  ;;  %v766_v9 = vld [vmem:[%s1368_s19] sm:$0xff] }
 0x120   : > { %v681_v12 = vadd.f32 %v680_v10, %v536_v62  ;;  %v994_v62 = vld [vmem:[%s1494_s4 + $0x8] sm:$0xff]  ;;  %v768_v10 = vld [vmem:[%s1368_s19 + $0x10] sm:$0xff] }
 0x121   : > { %v692_v34 = vmax.f32 %v666_v26, 0.0 }
 0x122   : > { %v698_v16 = vmax.f32 %v681_v12, 0.0 }
 0x123   : > { %v703_v42 = vpack.c.bf16 %v692_v34, %v691_v37 }
 0x124   : > { %v706_v20 = vpack.c.bf16 %v698_v16, %v697_v15  ;;  %v769_v16 = vld [vmem:[%s1368_s19 + $0x18] sm:$0xff]  ;;  %s785_s19 = scalar_lea.sflag [#allocation5], %s1361_s0 }
 0x126   : > { %747 = vmatpush.bf16.msra.mxu1 %v706_v20 }
 0x12a   : > { %748 = vmatpush.bf16.msra.mxu1 %v705_v27 }
 0x12e   : > { %749 = vmatpush.bf16.msra.mxu1 %v704_v35 }
 0x132   : > { %750 = vmatpush.bf16.msra.mxu1 %v703_v42 }
 0x136   : > { %751 = vmatpush.bf16.msra.mxu1 %v702_v50 }
 0x13a   : > { %752 = vmatpush.bf16.msra.mxu1 %v701_v53 }
 0x13e   : > { %753 = vmatpush.bf16.msra.mxu1 %v700_v59 }
 0x142   : > { %754 = vmatpush.bf16.msra.mxu1 %v699_v60 }
 0x145   : > { %755 = vmatmul.bf16.vlgmr.msra.gmra.mxu1 %v993_v61 }
 0x155   : > { %760 = vmatmul.bf16.gmra.mxu1 %v994_v62 }
 0x1c2   : > { %v756_v63 = vpop.f32.mrf.mxu1 }
 0x1c3   : > { %v757_v7 = vadd.f32 %v756_v63, %v718_v1 }
 0x1c5   : > { %v770_v12 = vmul.f32 %v766_v9, %v757_v7 }
 0x1ca   : > { %v758_v0 = vpop.f32.mrf.mxu1 }
 0x1cb   : > { %v759_v4 = vadd.f32 %v758_v0, %v723_v2 }
 0x1cd   : > { %v771_v11 = vmul.f32 %v767_v6, %v759_v4 }
 0x1cf   : > { %v774_v17 = vadd.f32 %v771_v11, %v770_v12 }
 0x1d2   : > { %v761_v3 = vpop.f32.mrf.mxu1 }
 0x1d3   : > { %v762_v8 = vadd.f32 %v761_v3, %v728_v5 }
 0x1d5   : > { %v772_v13 = vmul.f32 %v768_v10, %v762_v8 }
 0x1d7   : > { %v775_v19 = vadd.f32 %v774_v17, %v772_v13 }
 0x1da   : > { %v763_v15 = vpop.f32.mrf.mxu1 }
 0x1db   : > { %v764_v18 = vadd.f32 %v763_v15, %v733_v14 }
 0x1dd   : > { %v773_v20 = vmul.f32 %v769_v16, %v764_v18 }
 0x1df   : > { %v776_v21 = vadd.f32 %v775_v19, %v773_v20 }
 0x1e1   : > { %v777_v22 = vrot.slane %v776_v21, 4 }
 0x1e3   : > { %v778_v23 = vadd.f32 %v777_v22, %v776_v21 }
 0x1e5   : > { %v779_v24 = vrot.slane %v778_v23, 2 }
 0x1e7   : > { %v780_v25 = vadd.f32 %v779_v24, %v778_v23 }
 0x1e9   : > { %v781_v26 = vrot.slane %v780_v25, 1 }
 0x1eb   : > { %v782_v27 = vadd.f32 %v781_v26, %v780_v25 }
 0x1ed   : > { %783 = vst [vmem:[%s409_s2] sm:$0x1] %v782_v27 }
 0x1ee   : > { %1157 = shalt.err (!%p1154_p8)
}
 0x1ef   : > { %1017 = dma.vmem_to_hbm [thread:$0]  (%p1296_p11), %s796_s23, 16, %s798_s18, %s785_s19  }
 0x1f0 PF: > { %s809_s0 = sand.u32 1, %s1188_s21   ;;  %p1024_p9 = pnand %p894_p2, %p1300_p12 }
 0x1f1   : > { %s810_s30 = scalar_lea.sflag [#allocation5], %s809_s0 }
 0x1f2   : > { %p1025_p10 = pneg %p1024_p9 }
 0x1f4   : > { %1183 = dma.done.wait (%p1025_p10), %s810_s30, 16  }
 0x1f5   : > { %1185 = vsyncadd (%p1025_p10), %s810_s30, 4294967280  ;;  %s1509_s29 = sld [smem:[#allocation12_spill]]  ;;  %p20_p1 = scmp.ge.s32.totalorder %s1269_s27, 4  }
 0x1f6   : > { %s1510_s23 = sld [smem:[#allocation13_spill]]  ;;  %s1511_s21 = smov %s1192_s22 }
 0x1f7   : > { %s1513_s24 = smov %s1269_s27  ;;  %22 = sbr.rel (!%p20_p1) target bundleno = 9 (0x9), region = 142 }
 0x1fb   : > { %s1512_s22 = smov %s1509_s29 }
 0x1fc   :  { %815 = vsyncpa [#allocation4], 1 }
 0x1fd   :  { %817 = vsyncpa [#allocation4 + $0x1], 1 }
 0x1fe   :  { %818 = vsyncpa [#allocation7], 1 }
 0x1ff   :  { %819 = vsyncpa [#allocation5], 1 }
 0x200   :  { %821 = vsyncpa [#allocation5 + $0x1], 1 }

</bundles_post_ra>
